<compile_context>
chip_gen: v7x
topology: tpu7x:2x2x1
jax: 0.10.0
libtpu: 0.0.40
codegen_flags: <defaults>
</compile_context>

<pallas_src>
import jax
import jax.numpy as jnp
from jax.experimental import pallas as pl
from jax.experimental.pallas import tpu as pltpu


# ---------------------------------------------------------------------------
# Kernels
# ---------------------------------------------------------------------------

def _lora_linear_kernel(x_ref, w_ref, xa_ref, b_ref, res_ref, y_ref, acc_ref):
    """y = residual + x @ W_t + xa @ B     (xa = alpha * x @ A, precomputed).

    x_ref:   (TM, TK) activations (model dtype)
    w_ref:   (TK, TN) base weight tile, pre-transposed to (in, out) layout
    xa_ref:  (TM, R)  f32 hoisted LoRA left factor (j/k-invariant block)
    b_ref:   (R, TN)  lora_B tile (k-invariant block)
    res_ref: (TM, TN) residual tile (same array as x, indexed (i, j))
    y_ref:   (TM, TN) output tile
    acc_ref: (TM, TN) f32 scratch, base-matmul accumulator over K
    """
    k = pl.program_id(2)

    @pl.when(k == 0)
    def _init():
        acc_ref[...] = jnp.zeros_like(acc_ref)

    # Operands go to the MXU in their native (bf16/f32) dtype, f32 accumulate.
    acc_ref[...] += jnp.dot(x_ref[...], w_ref[...],
                            preferred_element_type=jnp.float32)

    @pl.when(k == pl.num_programs(2) - 1)
    def _finalize():
        # Tiny rank-R epilogue matmul, once per (i, j) output tile; done in
        # f32 so the LoRA path keeps accumulator precision.
        lora_out = jnp.dot(xa_ref[...], b_ref[...].astype(jnp.float32),
                           preferred_element_type=jnp.float32)
        y = res_ref[...].astype(jnp.float32) + acc_ref[...] + lora_out
        y_ref[...] = y.astype(y_ref.dtype)


def _plain_linear_kernel(x_ref, w_ref, res_ref, y_ref, acc_ref):
    """y = residual + x @ W_t  (non-LoRA-targeted projection)."""
    k = pl.program_id(2)

    @pl.when(k == 0)
    def _init():
        acc_ref[...] = jnp.zeros_like(acc_ref)

    acc_ref[...] += jnp.dot(x_ref[...], w_ref[...],
                            preferred_element_type=jnp.float32)

    @pl.when(k == pl.num_programs(2) - 1)
    def _finalize():
        y_ref[...] = (res_ref[...].astype(jnp.float32)
                      + acc_ref[...]).astype(y_ref.dtype)


# ---------------------------------------------------------------------------
# pallas_call wrappers
# ---------------------------------------------------------------------------

def _sublane_quantum(dtype):
    # f32 -> 8, bf16 -> 16, int8/fp8 -> 32
    return max(8, 32 // jnp.dtype(dtype).itemsize)


def _prepare_tiles(M, O, H, tm, tn, tk, dtype):
    """Clamp tiles to the array dims and validate TPU tiling quanta."""
    tm, tn, tk = min(tm, M), min(tn, O), min(tk, H)
    if not (M % tm == 0 and O % tn == 0 and H % tk == 0):
        raise ValueError(f"dims ({M},{O},{H}) not divisible by tiles "
                         f"({tm},{tn},{tk})")
    sub = _sublane_quantum(dtype)
    # Second-minor dims: multiple of the dtype sublane quantum or == full dim.
    if tm != M and tm % sub != 0:
        raise ValueError(f"tm={tm} not a multiple of sublane quantum {sub}")
    # Minor (lane) dims: multiple of 128 or == full dim.
    if tn != O and tn % 128 != 0:
        raise ValueError(f"tn={tn} not a multiple of 128")
    if tk != H and tk % 128 != 0:
        raise ValueError(f"tk={tk} not a multiple of 128")
    return tm, tn, tk


def lora_linear(x, w, lora_a, lora_b, residual, *, alpha=1.0,
                tm=512, tn=1024, tk=1024, vmem_limit_bytes=None):
    """residual + x @ (W + alpha*(A@B)^T)^T, computed in factored form.

    x:(M,H)  w:(O,H)  lora_a:(H,R)  lora_b:(R,O)  residual:(M,O)  ->  (M,O)

    Tile guidance (sweep tm/tn first -- they set arithmetic intensity):
      v7x : tm=512,  tn=1024,      tk=1024  (fits 64 MiB VMEM; default here)
      v6e : tm~1024, tn~1536-2048, tk=2048  + vmem_limit_bytes well above 32MiB
      v5e : tm=512,  tn=512-1024,  tk=1024  + vmem_limit_bytes (16 MiB default)
    Keep (M//tm)*(O//tn) >= 2 on v7x so both TensorCores get work.
    """
    M, H = x.shape
    O, H2 = w.shape
    assert H == H2 and residual.shape == (M, O)
    R = lora_a.shape[1]
    assert lora_a.shape == (H, R) and lora_b.shape == (R, O)
    tm, tn, tk = _prepare_tiles(M, O, H, tm, tn, tk, x.dtype)

    # Hoisted LoRA left factor: alpha folded into the tiny (M, R) intermediate.
    # Kept in f32 (negligible traffic) to preserve accumulator precision.
    xa = alpha * jnp.dot(x.astype(jnp.float32), lora_a.astype(jnp.float32))

    # One-time trace-level transpose of the static weight to (in, out) layout
    # so the in-kernel matmul is a plain MN-layout dot (no per-tile XLU
    # transpose risk from an (out,in) dot_general).
    w_t = w.T                                    # (H, O)

    itemsize = jnp.dtype(x.dtype).itemsize
    cost = pl.CostEstimate(
        flops=2 * M * O * H + 2 * M * R * O,
        transcendentals=0,
        bytes_accessed=((M * H + H * O + 2 * M * O) * itemsize
                        + R * O * jnp.dtype(lora_b.dtype).itemsize
                        + M * R * 4))

    return pl.pallas_call(
        _lora_linear_kernel,
        out_shape=jax.ShapeDtypeStruct((M, O), x.dtype),
        grid_spec=pltpu.PrefetchScalarGridSpec(
            num_scalar_prefetch=0,
            grid=(M // tm, O // tn, H // tk),
            in_specs=[
                pl.BlockSpec((tm, tk), lambda i, j, k: (i, k)),   # x
                pl.BlockSpec((tk, tn), lambda i, j, k: (k, j)),   # W^T (in,out)
                pl.BlockSpec((tm, R), lambda i, j, k: (i, 0)),    # xa (j/k-inv)
                pl.BlockSpec((R, tn), lambda i, j, k: (0, j)),    # lora_B (k-inv)
                pl.BlockSpec((tm, tn), lambda i, j, k: (i, j)),   # residual
            ],
            out_specs=pl.BlockSpec((tm, tn), lambda i, j, k: (i, j)),
            scratch_shapes=[pltpu.VMEM((tm, tn), jnp.float32)]),
        compiler_params=pltpu.CompilerParams(
            dimension_semantics=("parallel", "parallel", "arbitrary"),
            vmem_limit_bytes=vmem_limit_bytes),
        cost_estimate=cost,
    )(x, w_t, xa, lora_b, residual)


def plain_linear(x, w, residual, *, tm=512, tn=1024, tk=1024,
                 vmem_limit_bytes=None):
    """residual + x @ W^T for non-targeted projections (no LoRA math at all)."""
    M, H = x.shape
    O, H2 = w.shape
    assert H == H2 and residual.shape == (M, O)
    tm, tn, tk = _prepare_tiles(M, O, H, tm, tn, tk, x.dtype)

    w_t = w.T                                    # (H, O), trace-time transpose
    itemsize = jnp.dtype(x.dtype).itemsize
    cost = pl.CostEstimate(
        flops=2 * M * O * H,
        transcendentals=0,
        bytes_accessed=(M * H + H * O + 2 * M * O) * itemsize)

    return pl.pallas_call(
        _plain_linear_kernel,
        out_shape=jax.ShapeDtypeStruct((M, O), x.dtype),
        grid_spec=pltpu.PrefetchScalarGridSpec(
            num_scalar_prefetch=0,
            grid=(M // tm, O // tn, H // tk),
            in_specs=[
                pl.BlockSpec((tm, tk), lambda i, j, k: (i, k)),   # x
                pl.BlockSpec((tk, tn), lambda i, j, k: (k, j)),   # W^T
                pl.BlockSpec((tm, tn), lambda i, j, k: (i, j)),   # residual
            ],
            out_specs=pl.BlockSpec((tm, tn), lambda i, j, k: (i, j)),
            scratch_shapes=[pltpu.VMEM((tm, tn), jnp.float32)]),
        compiler_params=pltpu.CompilerParams(
            dimension_semantics=("parallel", "parallel", "arbitrary"),
            vmem_limit_bytes=vmem_limit_bytes),
        cost_estimate=cost,
    )(x, w_t, residual)


# ---------------------------------------------------------------------------
# Synthetic "base model" + LoRAModel forward (glue in plain JAX).
# ---------------------------------------------------------------------------

def init_params(key, *, vocab=64, hidden=256, rank=8, num_layers=4,
                dtype=jnp.float32):
    keys = jax.random.split(key, 1 + num_layers * 2 * 3)
    params = {"embed": (jax.random.normal(keys[0], (vocab, hidden)) * 0.02
                        ).astype(dtype)}
    k = 1
    for layer in range(num_layers):
        for mod in ("q_proj", "v_proj"):
            w = (jax.random.normal(keys[k], (hidden, hidden)) * 0.03).astype(dtype)
            k += 1
            a = jax.random.normal(keys[k], (hidden, rank)).astype(dtype)
            k += 1
            # NOTE: the PyTorch __init__ zero-inits lora_B (delta is zero at
            # init).  We use small non-zero values so the LoRA path is
            # actually exercised; forward semantics are identical either way.
            b = (jax.random.normal(keys[k], (rank, hidden)) * 0.01).astype(dtype)
            k += 1
            params[f"layers.{layer}.{mod}"] = {"weight": w, "lora_A": a,
                                               "lora_B": b}
    return params


def lora_model_forward(params, input_ids, *, alpha=1.0, num_layers=4,
                       target_layers=(0, 1, 2),
                       target_modules=("q_proj", "v_proj"),
                       tm=512, tn=1024, tk=1024, vmem_limit_bytes=None):
    B, S = input_ids.shape
    H = params["embed"].shape[1]
    # Token-embedding gather stays in plain JAX (cheap, irregular access).
    h = params["embed"][input_ids].reshape(B * S, H)
    for layer in range(num_layers):
        for mod in ("q_proj", "v_proj"):
            p = params[f"layers.{layer}.{mod}"]
            targeted = (layer in target_layers) and (mod in target_modules)
            if targeted:
                # residual fused inside the kernel (h passed as both x and res)
                h = lora_linear(h, p["weight"], p["lora_A"], p["lora_B"], h,
                                alpha=alpha, tm=tm, tn=tn, tk=tk,
                                vmem_limit_bytes=vmem_limit_bytes)
            else:
                # trace-time skip of the LoRA branch: plain base linear.
                h = plain_linear(h, p["weight"], h, tm=tm, tn=tn, tk=tk,
                                 vmem_limit_bytes=vmem_limit_bytes)
    return h.reshape(B, S, H)


def reference_forward(params, input_ids, *, alpha=1.0, num_layers=4,
                      target_layers=(0, 1, 2),
                      target_modules=("q_proj", "v_proj")):
    """Pure-JAX reference using the module's merged-weight semantics.

    All per-layer math is done in f32; the activation is cast back to the
    model dtype between projections (as a base model running in that dtype
    would do), so the comparison isolates the kernel's per-layer math.
    """
    B, S = input_ids.shape
    H = params["embed"].shape[1]
    model_dtype = params["embed"].dtype
    h = params["embed"][input_ids].reshape(B * S, H).astype(jnp.float32)
    for layer in range(num_layers):
        for mod in ("q_proj", "v_proj"):
            p = params[f"layers.{layer}.{mod}"]
            w = p["weight"].astype(jnp.float32)
            if (layer in target_layers) and (mod in target_modules):
                # merge-then-linear: W_eff = W + alpha * (A @ B)^T  (out, in)
                delta = (p["lora_A"].astype(jnp.float32)
                         @ p["lora_B"].astype(jnp.float32)).T
                w = w + alpha * delta
            h = h + h @ w.T
            h = h.astype(model_dtype).astype(jnp.float32)
    return h.reshape(B, S, H)


def _normalized_max_err(out, ref):
    out = out.astype(jnp.float32)
    ref = ref.astype(jnp.float32)
    return float(jnp.max(jnp.abs(out - ref)) / (jnp.max(jnp.abs(ref)) + 1e-12))


if __name__ == "__main__":
    key = jax.random.PRNGKey(0)
    k_param, k_ids = jax.random.split(key)

    # Small but lane-friendly shapes: hidden is a multiple of 128 so output
    # tiles are lane-dense; rank = 8.  Layer 3 is NOT targeted -> exercises
    # the plain-linear path.
    VOCAB, HIDDEN, RANK, LAYERS = 64, 256, 8, 4
    TARGET_LAYERS = (0, 1, 2)
    TARGET_MODULES = ("q_proj", "v_proj")
    BATCH, SEQ = 2, 8

    input_ids = jax.random.randint(k_ids, (BATCH, SEQ), 0, VOCAB,
                                   dtype=jnp.int32)

    # Demo tile sizes (tn=tk=128) force a non-trivial (1, 2, 2) grid so the
    # k-axis accumulation / pl.when init-finalize paths and the j loop
    # (k-invariant lora_B block) are exercised.  Two configs:
    #   f32  -> tight 1e-4 check (validates indexing/accumulation exactly)
    #   bf16 -> the recommended production operand dtype, 1e-2 check
    for dtype, tol in ((jnp.float32, 1e-4), (jnp.bfloat16, 1e-2)):
        params = init_params(k_param, vocab=VOCAB, hidden=HIDDEN, rank=RANK,
                             num_layers=LAYERS, dtype=dtype)
        out = lora_model_forward(params, input_ids, alpha=1.0,
                                 num_layers=LAYERS,
                                 target_layers=TARGET_LAYERS,
                                 target_modules=TARGET_MODULES,
                                 tm=256, tn=128, tk=128)
        out = jax.block_until_ready(out)
        assert out.shape == (BATCH, SEQ, HIDDEN)
        assert out.dtype == dtype

        ref = reference_forward(params, input_ids, alpha=1.0,
                                num_layers=LAYERS,
                                target_layers=TARGET_LAYERS,
                                target_modules=TARGET_MODULES)
        err = _normalized_max_err(out, ref)
        assert err < tol, f"{jnp.dtype(dtype).name} mismatch: rel_err={err}"

    # TODO(synk): the real module wraps llama-7b (attention/MLP/RMSNorm,
    # tokenizer); only the LoRA-patched linear hot path is kernelized here,
    # the transformer body is a synthetic residual q/v stand-in.
    print("KERNEL_OK")
</pallas_src>

<mosaic_0001>
module attributes {stable_mosaic.version = 11 : i64} {
  func.func @_lora_linear_kernel(%arg0: i32, %arg1: i32, %arg2: i32, %arg3: memref<16x128xf32, #tpu.memory_space<vmem>>, %arg4: memref<128x128xf32, #tpu.memory_space<vmem>>, %arg5: memref<16x8xf32, #tpu.memory_space<vmem>>, %arg6: memref<8x128xf32, #tpu.memory_space<vmem>>, %arg7: memref<16x128xf32, #tpu.memory_space<vmem>>, %arg8: memref<16x128xf32, #tpu.memory_space<vmem>>, %arg9: memref<16x128xf32, #tpu.memory_space<vmem>>) attributes {dimension_semantics = [#tpu.dimension_semantics<parallel>, #tpu.dimension_semantics<parallel>, #tpu.dimension_semantics<arbitrary>], iteration_bounds = array<i64: 1, 2, 2>, scalar_prefetch = 0 : i64, scratch_operands = 1 : i64, tpu.core_type = #tpu.core_type<tc>, window_params = [{transform_indices = @transform_0, window_bounds = array<i64: 16, 128>}, {transform_indices = @transform_1, window_bounds = array<i64: 128, 128>}, {transform_indices = @transform_2, window_bounds = array<i64: 16, 8>}, {transform_indices = @transform_3, window_bounds = array<i64: 8, 128>}, {transform_indices = @transform_4, window_bounds = array<i64: 16, 128>}, {transform_indices = @transform_5, window_bounds = array<i64: 16, 128>}]} {
    %c0_i32 = arith.constant 0 : i32
    %0 = arith.cmpi eq, %arg2, %c0_i32 : i32
    %1 = arith.extui %0 : i1 to i32
    %c0_i32_0 = arith.constant 0 : i32
    %2 = arith.cmpi ne, %1, %c0_i32_0 : i32
    scf.if %2 {
      %cst_9 = arith.constant 0.000000e+00 : f32
      %12 = vector.broadcast %cst_9 : f32 to vector<16x128xf32>
      %c0_10 = arith.constant 0 : index
      %c0_11 = arith.constant 0 : index
      %13 = vector.load %arg9[%c0_10, %c0_11] : memref<16x128xf32, #tpu.memory_space<vmem>>, vector<16x128xf32>
      tpu.vector_store %arg9[%c0_10, %c0_11], %12 {strides = array<i32>} : memref<16x128xf32, #tpu.memory_space<vmem>>, vector<16x128xf32>,
    } else {
    }
    %c0 = arith.constant 0 : index
    %c0_1 = arith.constant 0 : index
    %3 = vector.load %arg9[%c0, %c0_1] : memref<16x128xf32, #tpu.memory_space<vmem>>, vector<16x128xf32>
    %c0_2 = arith.constant 0 : index
    %c0_3 = arith.constant 0 : index
    %4 = vector.load %arg3[%c0_2, %c0_3] : memref<16x128xf32, #tpu.memory_space<vmem>>, vector<16x128xf32>
    %c0_4 = arith.constant 0 : index
    %c0_5 = arith.constant 0 : index
    %5 = vector.load %arg4[%c0_4, %c0_5] : memref<128x128xf32, #tpu.memory_space<vmem>>, vector<128x128xf32>
    %cst = arith.constant dense<0.000000e+00> : vector<16x128xf32>
    %6 = tpu.matmul %4, %5, %cst {dimension_numbers = #tpu.dot_dimension_numbers<[1], [0], [0], [1], [0, 0, 1, 1], [], []>} : vector<16x128xf32>, vector<128x128xf32>, vector<16x128xf32> -> vector<16x128xf32>
    %7 = arith.addf %3, %6 : vector<16x128xf32>
    %c0_6 = arith.constant 0 : index
    %c0_7 = arith.constant 0 : index
    %8 = vector.load %arg9[%c0_6, %c0_7] : memref<16x128xf32, #tpu.memory_space<vmem>>, vector<16x128xf32>
    tpu.vector_store %arg9[%c0_6, %c0_7], %7 {strides = array<i32>} : memref<16x128xf32, #tpu.memory_space<vmem>>, vector<16x128xf32>,
    %c1_i32 = arith.constant 1 : i32
    %9 = arith.cmpi eq, %arg2, %c1_i32 : i32
    %10 = arith.extui %9 : i1 to i32
    %c0_i32_8 = arith.constant 0 : i32
    %11 = arith.cmpi ne, %10, %c0_i32_8 : i32
    scf.if %11 {
      %c0_9 = arith.constant 0 : index
      %c0_10 = arith.constant 0 : index
      %12 = vector.load %arg5[%c0_9, %c0_10] : memref<16x8xf32, #tpu.memory_space<vmem>>, vector<16x8xf32>
      %c0_11 = arith.constant 0 : index
      %c0_12 = arith.constant 0 : index
      %13 = vector.load %arg6[%c0_11, %c0_12] : memref<8x128xf32, #tpu.memory_space<vmem>>, vector<8x128xf32>
      %cst_13 = arith.constant dense<0.000000e+00> : vector<16x128xf32>
      %14 = tpu.matmul %12, %13, %cst_13 {dimension_numbers = #tpu.dot_dimension_numbers<[1], [0], [0], [1], [0, 0, 1, 1], [], []>} : vector<16x8xf32>, vector<8x128xf32>, vector<16x128xf32> -> vector<16x128xf32>
      %c0_14 = arith.constant 0 : index
      %c0_15 = arith.constant 0 : index
      %15 = vector.load %arg7[%c0_14, %c0_15] : memref<16x128xf32, #tpu.memory_space<vmem>>, vector<16x128xf32>
      %c0_16 = arith.constant 0 : index
      %c0_17 = arith.constant 0 : index
      %16 = vector.load %arg9[%c0_16, %c0_17] : memref<16x128xf32, #tpu.memory_space<vmem>>, vector<16x128xf32>
      %17 = arith.addf %15, %16 : vector<16x128xf32>
      %18 = arith.addf %17, %14 : vector<16x128xf32>
      %c0_18 = arith.constant 0 : index
      %c0_19 = arith.constant 0 : index
      %19 = vector.load %arg8[%c0_18, %c0_19] : memref<16x128xf32, #tpu.memory_space<vmem>>, vector<16x128xf32>
      tpu.vector_store %arg8[%c0_18, %c0_19], %18 {strides = array<i32>} : memref<16x128xf32, #tpu.memory_space<vmem>>, vector<16x128xf32>,
    } else {
    }
    return
  }
  func.func @transform_0(%arg0: i32, %arg1: i32, %arg2: i32) -> (i32, i32) {
    %c0_i32 = arith.constant 0 : i32
    return %arg0, %arg2 : i32, i32
  }
  func.func @transform_1(%arg0: i32, %arg1: i32, %arg2: i32) -> (i32, i32) {
    %c0_i32 = arith.constant 0 : i32
    return %arg2, %arg1 : i32, i32
  }
  func.func @transform_2(%arg0: i32, %arg1: i32, %arg2: i32) -> (i32, i32) {
    %c0_i32 = arith.constant 0 : i32
    %c0_i32_0 = arith.constant 0 : i32
    return %arg0, %c0_i32 : i32, i32
  }
  func.func @transform_3(%arg0: i32, %arg1: i32, %arg2: i32) -> (i32, i32) {
    %c0_i32 = arith.constant 0 : i32
    %c0_i32_0 = arith.constant 0 : i32
    return %c0_i32, %arg1 : i32, i32
  }
  func.func @transform_4(%arg0: i32, %arg1: i32, %arg2: i32) -> (i32, i32) {
    %c0_i32 = arith.constant 0 : i32
    return %arg0, %arg1 : i32, i32
  }
  func.func @transform_5(%arg0: i32, %arg1: i32, %arg2: i32) -> (i32, i32) {
    %c0_i32 = arith.constant 0 : i32
    return %arg0, %arg1 : i32, i32
  }
}

</mosaic_0001>

<bundles_post_ra>
// kernel: tpu_custom_call.1
= control target key start
LH: loop header
LB: loop body
LE: loop exit
PB: predicated region body
PF: predicated region fallthrough
CT: control target
= control target key end

     0   :  { %s1781_s0 = inlined_call_operand.hbm [shape: f32[16,256], index: 0, kind: input, shape index: {}]   ;;  %s1782_s1 = inlined_call_operand.hbm [shape: f32[256,256], index: 1, kind: input, shape index: {}]   ;;  %s1783_s2 = inlined_call_operand.vmem [shape: f32[16,8], index: 2, kind: input, shape index: {}]   ;;  %s1784_s3 = inlined_call_operand.hbm [shape: f32[8,256], index: 3, kind: input, shape index: {}]   ;;  %s1785_s4 = inlined_call_operand.vmem [shape: f32[16,256], index: 4, kind: input, shape index: {}]   ;;  %s1786_s5 = inlined_call_operand.hbm [shape: f32[16,256], index: 5, kind: output, shape index: {}]  }
   0x1   :  { %1805 = sst [smem:[#allocation28_spill]] %s1782_s1 }
   0x2   :  { %1806 = sst [smem:[#allocation29_spill]] %s1783_s2 }
   0x3   :  { %1807 = sst [smem:[#allocation30_spill]] %s1786_s5 }
   0x4   :  { %10 = vsyncpa [#allocation4], 0 }
   0x5   :  { %12 = vsyncpa [#allocation4 + $0x1], 0 }
   0x6   :  { %13 = vsyncpa [#allocation7], 0 }
   0x7   :  { %15 = vsyncpa [#allocation7 + $0x1], 0 }
   0x8   :  { %16 = vsyncpa [#allocation5], 0 }
   0x9   :  { %18 = vsyncpa [#allocation5 + $0x1], 0  ;;  %s1362_s18 = smov 0   ;;  %s1364_s19 = smov 0  }
   0xa   :  { %s1366_s20 = smov 0   ;;  %s1368_s21 = smov 0  }
   0xb   :  { %s1370_s22 = smov 0   ;;  %s1372_s23 = smov 0  }
   0xc   :  { %s1374_s24 = smov 0   ;;  %s1376_s25 = smov 0  }
   0xd   :  { %s1378_s26 = smov 0   ;;  %s1380_s27 = smov 0  }
   0xe   :  { %s1382_s28 = smov 0   ;;  %s1384_s29 = smov 0  }
   0xf   :  { %s1386_s30 = smov 0   ;;  %s1388_s6 = smov 0  }
  0x10 LB: > { %1808 = sst [smem:[#allocation15_spill]] %s1267_s18  ;;  %s1431_s7 = sadd.s32 4294967295, %s1319_s6   ;;  %s1319_s6 = sphi %s1388_s6, %s24_s6   ;;  %s1315_s30 = sphi %s1386_s30, %s1870_s30   ;;  %s1311_s29 = sphi %s1384_s29, %s1869_s29   ;;  %s1307_s28 = sphi %s1382_s28, %s1868_s28   ;;  %s1303_s27 = sphi %s1380_s27, %s1867_s27   ;;  %s1299_s26 = sphi %s1378_s26, %s1866_s26   ;;  %s1295_s25 = sphi %s1376_s25, %s1865_s25   ;;  %s1291_s24 = sphi %s1374_s24, %s1864_s24   ;;  %s1287_s23 = sphi %s1372_s23, %s1863_s23   ;;  %s1283_s22 = sphi %s1370_s22, %s1862_s22   ;;  %s1279_s21 = sphi %s1368_s21, %s1861_s21   ;;  %s1275_s20 = sphi %s1366_s20, %s1860_s20   ;;  %s1271_s19 = sphi %s1364_s19, %s1859_s19   ;;  %s1267_s18 = sphi %s1362_s18, %s1851_s18  }
  0x11   : > { %1809 = sst [smem:[#allocation16_spill]] %s1271_s19  ;;  %s36_s9 = sadd.s32 1, %s1311_s29 }
  0x12   : > { %1810 = sst [smem:[#allocation17_spill]] %s1287_s23  ;;  %s39_s10 = sadd.s32 1, %s1315_s30 }
  0x13   : > { %1811 = sst [smem:[#allocation18_spill]] %s1303_s27  ;;  %p37_p0 = scmp.ge.s32.totalorder %s36_s9, 2 }
  0x14   : > { %1812 = sst [smem:[#allocation19_spill]] %s1307_s28  ;;  %s52_s11 = sadd.s32 1, %s1299_s26 }
  0x15   : > { %p59_p1 = scmp.ne.s32.totalorder %s1299_s26, %s1295_s25  ;;  %p60_p2 = scmp.eq.s32.totalorder %s1319_s6, 0 }
  0x16   : > { %s1872_s9 = smov (%p37_p0, %s36_s9), 0  ;;  %s1874_s10 = smov (!%p37_p0, %s39_s10), %s1315_s30 }
  0x17   : > { %1813 = sst [smem:[#allocation20_spill]] %s1872_s9  ;;  %s48_s12 = ssub.s32 %s1311_s29, %s1872_s9 }
  0x18   : > { %p1447_p3 = por %p60_p2, %p59_p1  ;;  %p41_p4 = scmp.ge.s32.totalorder %s1874_s10, 2 }
  0x19   : > { %p50_p5 = scmp.eq.s32.totalorder %s48_s12, 0  ;;  %p65_p6 = scmp.ne.s32.totalorder %s1295_s25, %s1291_s24 }
  0x1a   : > { %p66_p7 = scmp.eq.s32.totalorder %s1431_s7, 0  ;;  %s1876_s10 = smov (%p41_p4, %s1874_s10), 0 }
  0x1b   : > { %1815 = sst [smem:[#allocation21_spill]] %s1876_s10  ;;  %s76_s16 = ssub.s32 %s1315_s30, %s1876_s10 }
  0x1c   : > { %s1456_s14 = scalar_select %p50_p5, %s1299_s26, %s52_s11  }
  0x1d   : > { %p1460_p8 = por %p66_p7, %p65_p6  ;;  %s77_s17 = sor.u32 %s76_s16, %s48_s12 }
  0x1e   : > { %1816 = sst [smem:[#allocation22_spill]] %s1456_s14  ;;  %s80_s24 = sadd.s32 1, %s1287_s23 }
  0x1f   : > { %s1817_s15 = scalar_select %p1460_p8, 1, 0 }
  0x20   : > { %p78_p9 = scmp.eq.s32.totalorder %s77_s17, 0  ;;  %p87_p10 = scmp.ne.s32.totalorder %s1287_s23, %s1283_s22 }
  0x21   : > { %p93_p11 = scmp.ne.s32.totalorder %s1283_s22, %s1279_s21  ;;  %p130_p12 = scmp.eq.s32.totalorder %s76_s16, 0 }
  0x22   : > { %s1472_s8 = scalar_select %p78_p9, %s1287_s23, %s80_s24  }
  0x23   : > { %p1476_p13 = por %p87_p10, %p60_p2  ;;  %p1482_p0 = por %p93_p11, %p66_p7 }
  0x24   : > { %1818 = sst [smem:[#allocation23_spill]] %s1472_s8  ;;  %s132_s10 = sadd.s32 1, %s1275_s20 }
  0x25   : > { %s1820_s9 = scalar_select %p1482_p0, 1, 0 }
  0x26   : > { %p139_p1 = scmp.ne.s32.totalorder %s1275_s20, %s1271_s19  ;;  %p145_p5 = scmp.ne.s32.totalorder %s1271_s19, %s1267_s18 }
  0x27   : > { %s1490_s12 = scalar_select %p130_p12, %s1275_s20, %s132_s10  }
  0x28   : > { %p1494_p4 = por %p139_p1, %p60_p2  ;;  %p199_p6 = scmp.eq.s32.totalorder %s1431_s7, 3 }
  0x29   : > { %1821 = sst [smem:[#allocation24_spill]] %s1490_s12  ;;  %s1823_s16 = sadd.s32 4294967294, %s1319_s6  }
  0x2a   : > { %s1822_s21 = scalar_select %p1494_p4, 1, 0 }
  0x2b   : > { %p205_p9 = scmp.eq.s32.totalorder %s1823_s16, 3  ;;  %p1505_p10 = por %p145_p5, %p66_p7 }
  0x2c   : > { %p1509_p11 = por %p199_p6, %p139_p1  ;;  %p830_p2 = scmp.ge.s32.totalorder %s1319_s6, 4 }
  0x2d   : > { %s1824_s17 = scalar_select %p1505_p10, 1, 0 }
  0x2e   : > { %s1826_s24 = scalar_select %p1509_p11, 1, 0 }
  0x2f   : > { %1825 = sst [smem:[#allocation25_spill]] %s1824_s17  ;;  %p1513_p12 = por %p205_p9, %p145_p5 }
  0x30   : > { %1827 = sst [smem:[#allocation26_spill]] %s1826_s24  ;;  %230 = sbr.rel (%p830_p2) target bundleno = 142 (0x8e), region = 20 }
  0x31   : > { %s1828_s10 = scalar_select %p1513_p12, 1, 0 }
  0x32   : > { %s257_s16 = sand.u32 (!%p830_p2), 1, %s1319_s6   ;;  %s259_s14 = sand.u32 (!%p830_p2), 1, %s1287_s23  }
  0x33   : > { %1829 = sst [smem:[#allocation27_spill]] %s1828_s10  ;;  %s833_s8 = sshll.u32 (!%p830_p2), %s259_s14, 7 }
  0x34   : > { %s855_s12 = sshll.u32 (!%p830_p2), %s1311_s29, 5  ;;  %s261_s28 = scalar_lea.vmem (!%p830_p2), [#allocation6], %s833_s8 }
  0x35   : > { %s267_s18 = sadd.s32 (!%p830_p2), %s1315_s30, %s855_s12  ;;  %s270_s24 = sshll.u32 (!%p830_p2), %s261_s28, 4  ;;  %s1527_s24 = int_to_ptr.vmem [resolvable:$true] %s270_s24 }
  0x36   : > { %s836_s5 = sshll.u32 (!%p830_p2), %s267_s18, 7  ;;  %s1830_s1 = sld [smem:[#allocation28_spill]] (!%p830_p2) }
  0x37   : > { %s1529_s17 = scalar_lea.sflag [#allocation7], %s257_s16 }
  0x3c   : > { %s1525_s10 = scalar_lea.hbm %s1830_s1, %s836_s5  ;;  %s1085_s8 = scalar_lea.hbm %s1830_s1, 8192 }
  0x3d   : > { %s1081_s23 = scalar_lea.hbm %s1525_s10, 2048  ;;  %p1086_p6 = scmp.lt.u32.totalorder %s1525_s10, %s1830_s1 }
  0x3e   : > { %p1082_p7 = scmp.ne.s32.totalorder %s1525_s10, %s1081_s23  ;;  %p1087_p9 = scmp.lt.u32.totalorder %s1085_s8, %s1081_s23 }
  0x3f   : > { %p1089_p12 = scmp.lt.u32.totalorder %s1081_s23, %s1525_s10 }
  0x40   : > { %p1083_p1 = pnand %p1082_p7, %p1476_p13  ;;  %p1088_p2 = por %p1087_p9, %p1086_p6 }
  0x42   : > { %p1084_p5 = pneg %p1083_p1  ;;  %p1090_p11 = por %p1089_p12, %p1088_p2 }
  0x44   : > { %p1091_p10 = pnand %p1090_p11, %p1084_p5 }
  0x46   : > { %1094 = shalt.err (!%p1091_p10)
}
  0x47   : > { %s1095_s27 = scalar_lea.vmem %s1527_s24, 2048  ;;  %s1321_s14 = smov [#allocation6]  }
  0x48   : > { %p1096_p7 = scmp.ne.s32.totalorder %s1527_s24, %s1095_s27  ;;  %s1099_s12 = sshll.u32 %s1321_s14, 4  ;;  %s1100_s12 = int_to_ptr.vmem [resolvable:$false] %s1099_s12 }
  0x49   : > { %s1101_s16 = scalar_lea.vmem %s1100_s12, 4096  ;;  %p1102_p8 = scmp.lt.s32.totalorder %s1527_s24, %s1100_s12 }
  0x4a   : > { %p1097_p1 = pnand %p1096_p7, %p1476_p13  ;;  %p1103_p4 = scmp.lt.s32.totalorder %s1101_s16, %s1095_s27 }
  0x4c   : > { %p1098_p0 = pneg %p1097_p1  ;;  %p1104_p6 = por %p1103_p4, %p1102_p8 }
  0x4e   : > { %p1105_p9 = pnand %p1104_p6, %p1098_p0 }
  0x50   : > { %1108 = shalt.err (!%p1105_p9)
}
  0x51   : > { %s1804_s23 = smov 256   ;;  %s1323_s18 = smov 128  }
  0x52   : > { %s1324_s28 = smov 8   ;;  %s234_s8 = sand.u32 1, %s1299_s26  }
  0x53   : > { %950 = dma.hbm_to_vmem [thread:$0]  (%p1476_p13), %s1525_s10, 2048, %s1527_s24, %s1529_s17, %s1804_s23, %s1323_s18, %s1324_s28  }
  0x54   : > { %s832_s2 = sshll.u32 %s1311_s29, 7  ;;  %s831_s5 = sshll.u32 %s234_s8, 4 }
  0x55   : > { %s1561_s12 = scalar_lea.hbm %s1781_s0, %s832_s2  ;;  %s238_s16 = scalar_lea.vmem [#allocation3], %s831_s5 }
  0x56   : > { %s247_s1 = sshll.u32 %s238_s16, 4  ;;  %s282_s19 = sand.u32 1, %s1275_s20   ;;  %s1564_s1 = int_to_ptr.vmem [resolvable:$true] %s247_s1 }
  0x57   : > { %s1568_s11 = sshll.u32 %s282_s19, 3  ;;  %s1570_s24 = scalar_lea.sflag [#allocation4], %s234_s8 }
  0x58   : > { %s1109_s10 = scalar_lea.hbm %s1561_s12, 256  ;;  %s1113_s14 = scalar_lea.hbm %s1781_s0, 512 }
  0x59   : > { %p1110_p8 = scmp.ne.s32.totalorder %s1561_s12, %s1109_s10  ;;  %p1114_p4 = scmp.lt.u32.totalorder %s1561_s12, %s1781_s0 }
  0x5a   : > { %p1115_p10 = scmp.lt.u32.totalorder %s1113_s14, %s1109_s10  ;;  %p1117_p12 = scmp.lt.u32.totalorder %s1109_s10, %s1561_s12 }
  0x5b   : > { %p1111_p13 = pnand %p1110_p8, %p1447_p3 }
  0x5c   : > { %p1116_p11 = por %p1115_p10, %p1114_p4 }
  0x5d   : > { %p1112_p0 = pneg %p1111_p13 }
  0x5e   : > { %p1118_p5 = por %p1117_p12, %p1116_p11 }
  0x60   : > { %p1119_p2 = pnand %p1118_p5, %p1112_p0 }
  0x62   : > { %1122 = shalt.err (!%p1119_p2)
}
  0x63   : > { %s1123_s8 = scalar_lea.vmem %s1564_s1, 256  ;;  %s1325_s16 = smov [#allocation3]  }
  0x64   : > { %p1124_p7 = scmp.ne.s32.totalorder %s1564_s1, %s1123_s8  ;;  %s1127_s2 = sshll.u32 %s1325_s16, 4  ;;  %s1128_s2 = int_to_ptr.vmem [resolvable:$false] %s1127_s2 }
  0x65   : > { %s1129_s23 = scalar_lea.vmem %s1128_s2, 512  ;;  %p1130_p9 = scmp.lt.s32.totalorder %s1564_s1, %s1128_s2 }
  0x66   : > { %p1125_p1 = pnand %p1124_p7, %p1447_p3  ;;  %p1131_p8 = scmp.lt.s32.totalorder %s1129_s23, %s1123_s8 }
  0x68   : > { %p1126_p6 = pneg %p1125_p1  ;;  %p1132_p13 = por %p1131_p8, %p1130_p9 }
  0x6a   : > { %p1133_p4 = pnand %p1132_p13, %p1126_p6 }
  0x6c   : > { %1136 = shalt.err (!%p1133_p4)
}
  0x6d   : > { %s1831_s10 = smov 256   ;;  %s838_s27 = sshll.u32 %s1315_s30, 7 }
  0x6e   : > { %949 = dma.hbm_to_vmem [thread:$0]  (%p1447_p3), %s1561_s12, 256, %s1564_s1, %s1570_s24, %s1831_s10, %s1323_s18, %s1324_s28  }
  0x6f   : > { %s1601_s8 = scalar_lea.hbm %s1784_s3, %s838_s27  ;;  %s284_s13 = scalar_lea.vmem [#allocation8], %s1568_s11 }
  0x70   : > { %s291_s16 = sshll.u32 %s284_s13, 4  ;;  %s1137_s2 = scalar_lea.hbm %s1601_s8, 128  ;;  %s292_s16 = int_to_ptr.vmem [resolvable:$true] %s291_s16 }
  0x71   : > { %p1138_p0 = scmp.ne.s32.totalorder %s1601_s8, %s1137_s2  ;;  %p1832_p10 = scmp.ne.s32.totalorder %s1822_s21, 0 }
  0x72   : > { %s1141_s18 = scalar_lea.hbm %s1784_s3, 256  ;;  %p1142_p3 = scmp.lt.u32.totalorder %s1601_s8, %s1784_s3 }
  0x73   : > { %p1139_p11 = pnand %p1138_p0, %p1832_p10  ;;  %p1143_p5 = scmp.lt.u32.totalorder %s1141_s18, %s1137_s2 }
  0x74   : > { %p1145_p7 = scmp.lt.u32.totalorder %s1137_s2, %s1601_s8 }
  0x75   : > { %p1140_p12 = pneg %p1139_p11  ;;  %p1144_p2 = por %p1143_p5, %p1142_p3 }
  0x77   : > { %p1146_p1 = por %p1145_p7, %p1144_p2 }
  0x79   : > { %p1147_p6 = pnand %p1146_p1, %p1140_p12 }
  0x7b   : > { %1150 = shalt.err (!%p1147_p6)
}
  0x7c   : > { %s1151_s11 = scalar_lea.vmem %s292_s16, 128  ;;  %s1326_s24 = smov [#allocation8]  }
  0x7d   : > { %p1152_p9 = scmp.ne.s32.totalorder %s292_s16, %s1151_s11  ;;  %s1155_s10 = sshll.u32 %s1326_s24, 4  ;;  %s1156_s10 = int_to_ptr.vmem [resolvable:$false] %s1155_s10 }
  0x7e   : > { %s1157_s27 = scalar_lea.vmem %s1156_s10, 256  ;;  %p1158_p4 = scmp.lt.s32.totalorder %s292_s16, %s1156_s10 }
  0x7f   : > { %p1153_p8 = pnand %p1152_p9, %p1832_p10  ;;  %p1159_p0 = scmp.lt.s32.totalorder %s1157_s27, %s1151_s11 }
  0x81   : > { %p1154_p13 = pneg %p1153_p8  ;;  %p1160_p11 = por %p1159_p0, %p1158_p4 }
  0x83   : > { %p1161_p3 = pnand %p1160_p11, %p1154_p13 }
  0x85   : > { %1164 = shalt.err (!%p1161_p3)
}
  0x86   : > { %951 = dma.hbm_to_vmem [thread:$0]  (%p1832_p10), %s1601_s8, 128, %s292_s16, %s1529_s17  }
  0x87   : > { %297 = sbr.rel (!%p1832_p10) target bundleno = 142 (0x8e), region = 36  ;;  %s839_s14 = sshll.u32 (%p1832_p10), %s282_s19, 4 }
  0x88   : > { %s840_s5 = sshll.u32 (%p1832_p10), %s1315_s30, 3  ;;  %s301_s1 = scalar_lea.vmem (%p1832_p10), [#allocation9], %s839_s14 }
  0x89   : > { %s306_s23 = scalar_lea.vmem (%p1832_p10), %s1785_s4, %s840_s5 }
  0x8a   : > { %v336_v0 = vld [vmem:[%s306_s23] sm:$0xff] (%p1832_p10)  ;;  %v338_v1 = vld [vmem:[%s306_s23 + $0x10] sm:$0xff] (%p1832_p10) }
  0x8b   : > { %337 = vst [vmem:[%s301_s1] sm:$0xff] (%p1832_p10), %v336_v0  ;;  %339 = vst [vmem:[%s301_s1 + $0x8] sm:$0xff] (%p1832_p10), %v338_v1 }
  0x8e PF: > { %p841_p12 = scmp.ge.s32.totalorder %s1319_s6, 1  ;;  %p344_p10 = scmp.lt.s32.totalorder %s1319_s6, 5 }
  0x90   : > { %p345_p5 = pnand %p841_p12, %p344_p10 }
  0x91   : > { %s350_s19 = sand.u32 (!%p345_p5), 1, %s1295_s25   ;;  %p1833_p2 = scmp.ne.s32.totalorder (!%p345_p5), %s1817_s15, 0 }
  0x92   : > { %348 = sbr.rel (%p345_p5) target bundleno = 676 (0x2a4), region = 74  ;;  %s1633_s21 = sshll.u32 (!%p345_p5), %s350_s19, 4 }
  0x93   : > { %s351_s17 = scalar_lea.sflag (!%p345_p5), [#allocation4], %s350_s19  ;;  %s354_s8 = scalar_lea.vmem (!%p345_p5), [#allocation3], %s1633_s21 }
  0x99   : > { %1250 = dma.done.wait (%p1833_p2), %s351_s17, 256  }
  0x9a   : > { %1252 = vsyncadd (%p1833_p2), %s351_s17, 4294967040  ;;  %s359_s16 = sand.u32 1, %s1431_s7   ;;  %s361_s18 = sand.u32 1, %s1283_s22  }
  0x9b   : > { %s843_s28 = sshll.u32 %s361_s18, 7  ;;  %s360_s12 = scalar_lea.sflag [#allocation7], %s359_s16 }
  0x9c   : > { %s1642_s11 = scalar_lea.vmem [#allocation6], %s843_s28  ;;  %p1834_p7 = scmp.ne.s32.totalorder %s1820_s9, 0 }
  0x9e   : > { %1254 = dma.done.wait (%p1834_p7), %s360_s12, 2048  }
  0x9f   : > { %1256 = vsyncadd (%p1834_p7), %s360_s12, 4294965248  ;;  %s1835_s24 = sld [smem:[#allocation16_spill]]  ;;  %s1836_s10 = sld [smem:[#allocation25_spill]] }
  0xa5   : > { %s1649_s27 = sand.u32 1, %s1835_s24   ;;  %p1837_p1 = scmp.ne.s32.totalorder %s1836_s10, 0 }
  0xa6   : > { %s844_s15 = sshll.u32 %s1649_s27, 3 }
  0xa7   : > { %s1652_s14 = scalar_lea.vmem [#allocation8], %s844_s15 }
  0xa8   : > { %1258 = dma.done.wait (%p1837_p1), %s360_s12, 128  }
  0xa9   : > { %1260 = vsyncadd (%p1837_p1), %s360_s12, 4294967168  ;;  %s845_s7 = sshll.u32 %s1649_s27, 4  ;;  %s1838_s9 = sld [smem:[#allocation18_spill]] }
  0xaa   : > { %s1659_s5 = scalar_lea.vmem [#allocation9], %s845_s7  ;;  %s1661_s13 = scalar_lea.vmem [#allocation10], %s845_s7 }
  0xaf   : > { %p847_p6 = scmp.ne.s32.totalorder %s1838_s9, 0 }
  0xb0   : > { %v1327_v2 = vmov (!%p847_p6), 0.0  }
  0xb1   : > { %438 = sbr.rel (%p847_p6) target bundleno = 184 (0xb8), region = 94  ;;  %439 = vst [vmem:[#allocation2] sm:$0xff] (!%p847_p6), %v1327_v2  ;;  %440 = vst [vmem:[#allocation2 + $0x8] sm:$0xff] (!%p847_p6), %v1327_v2 }
  0xb8 PF: > { %v445_v3 = vld [vmem:[%s1642_s11] sm:$0xff]  ;;  %v446_v4 = vld [vmem:[%s1642_s11 + $0x8] sm:$0xff]  ;;  %v447_v5 = vld [vmem:[%s1642_s11 + $0x10] sm:$0xff]  ;;  %s1839_s2 = sld [smem:[#allocation18_spill]] }
  0xb9   : > { %v917_v6 = vpack.c.bf16 %v446_v4, %v445_v3  ;;  %v448_v7 = vld [vmem:[%s1642_s11 + $0x18] sm:$0xff]  ;;  %v449_v9 = vld [vmem:[%s1642_s11 + $0x20] sm:$0xff]  ;;  %v450_v10 = vld [vmem:[%s1642_s11 + $0x28] sm:$0xff] }
  0xba   : > { %v921_v8 = vpack.c.bf16 %v448_v7, %v447_v5  ;;  %v925_v11 = vpack.c.bf16 %v450_v10, %v449_v9  ;;  %v443_v12 = vld [vmem:[%s354_s8] sm:$0xff]  ;;  %v452_v14 = vld [vmem:[%s1642_s11 + $0x38] sm:$0xff]  ;;  %v454_v17 = vld [vmem:[%s1642_s11 + $0x48] sm:$0xff] }
  0xbb   : > { %918 = vmatprep.subr.bf16.mxu0 %v917_v6  ;;  %v451_v13 = vld [vmem:[%s1642_s11 + $0x30] sm:$0xff]  ;;  %909 = vmatprep.mubr.f32.mxu0 %v443_v12  ;;  %v453_v16 = vld [vmem:[%s1642_s11 + $0x40] sm:$0xff]  ;;  %v456_v20 = vld [vmem:[%s1642_s11 + $0x58] sm:$0xff] }
  0xbc   : > { %920 = vmatpush3.bf16.msra.mxu0 %v917_v6  ;;  %v929_v15 = vpack.c.bf16 %v452_v14, %v451_v13  ;;  %v933_v18 = vpack.c.bf16 %v454_v17, %v453_v16  ;;  %v455_v19 = vld [vmem:[%s1642_s11 + $0x50] sm:$0xff]  ;;  %v457_v22 = vld [vmem:[%s1642_s11 + $0x60] sm:$0xff]  ;;  %v458_v23 = vld [vmem:[%s1642_s11 + $0x68] sm:$0xff] }
  0xbd   : > { %922 = vmatprep.subr.bf16.mxu0 %v921_v8  ;;  %v937_v21 = vpack.c.bf16 %v456_v20, %v455_v19  ;;  %v941_v24 = vpack.c.bf16 %v458_v23, %v457_v22  ;;  %v459_v25 = vld [vmem:[%s1642_s11 + $0x70] sm:$0xff]  ;;  %v460_v26 = vld [vmem:[%s1642_s11 + $0x78] sm:$0xff] }
  0xbe   : > { %v945_v27 = vpack.c.bf16 %v460_v26, %v459_v25  ;;  %v444_v28 = vld [vmem:[%s354_s8 + $0x8] sm:$0xff]  ;;  %v441_v30 = vld [vmem:[#allocation2] sm:$0xff]  ;;  %p848_p9 = scmp.ne.s32.totalorder %s1839_s2, 1 }
  0xbf   : > { %v442_v29 = vld [vmem:[#allocation2 + $0x8] sm:$0xff]  ;;  %v546_v35 = vld [vmem:[%s1652_s14] sm:$0xff] (!%p848_p9)  ;;  %s1840_s19 = sld [smem:[#allocation29_spill]] (!%p848_p9)  ;;  %vm547_vm0 = vcmask (!%p848_p9), 64512   ;;  %v629_v40 = vld [vmem:[%s1659_s5] sm:$0xff] (!%p848_p9) }
  0xc0   : > { %924 = vmatpush3.bf16.msra.mxu0 %v921_v8  ;;  %v630_v38 = vld [vmem:[%s1659_s5 + $0x8] sm:$0xff] (!%p848_p9) }
  0xc1   : > { %926 = vmatprep.subr.bf16.mxu0 %v925_v11 }
  0xc4   : > { %928 = vmatpush3.bf16.msra.mxu0 %v925_v11 }
  0xc5   : > { %930 = vmatprep.subr.bf16.mxu0 %v929_v15  ;;  %s1841_s17 = smov (!%p848_p9), %s1840_s19  ;;  %v544_v36 = vld [vmem:[%s1840_s19] sm:$0xff] (!%p848_p9) }
  0xc6   : > { %v545_v37 = vld [vmem:[%s1841_s17 + $0x8] sm:$0xff] (!%p848_p9) }
  0xc8   : > { %932 = vmatpush3.bf16.msra.mxu0 %v929_v15 }
  0xc9   : > { %934 = vmatprep.subr.bf16.mxu0 %v933_v18 }
  0xcc   : > { %936 = vmatpush3.bf16.msra.mxu0 %v933_v18 }
  0xcd   : > { %938 = vmatprep.subr.bf16.mxu0 %v937_v21 }
  0xd0   : > { %940 = vmatpush3.bf16.msra.mxu0 %v937_v21 }
  0xd1   : > { %942 = vmatprep.subr.bf16.mxu0 %v941_v24 }
  0xd4   : > { %944 = vmatpush3.bf16.msra.mxu0 %v941_v24 }
  0xd5   : > { %946 = vmatprep.subr.bf16.mxu0 %v945_v27 }
  0xd8   : > { %948 = vmatpush3.bf16.msra.mxu0 %v945_v27 }
  0xd9   : > { %912 = vmatprep.subr.mxu0 (!%p848_p9), %v546_v35 }
  0xdb   : > { %910 = vmatmul.mubr.f32.vlgmr.msra.gmra.mrb[0].mxu0 %v444_v28 }
  0xdc   : > { %914 = vmatprep.mubr.msk.f32.mxu0 (!%p848_p9), %vm547_vm0, %v544_v36  ;;  %913 = vmatpush3.msra.mxu0 (!%p848_p9), %v546_v35 }
 0x1ac   : > { %543 = sbr.rel (%p848_p9) target bundleno = 647 (0x287), region = 98 }
 0x1ae   : > { %v911_v31 = vpop.f32.mrb[0].mxu0 }
 0x1af   : > { %v537_v32 = vadd.f32 %v911_v31, %v442_v29  ;;  %v527_v33 = vpop.f32.mrb[1].mxu0  ;;  %915 = vmatmul.mubr.msk.f32.vlgmr.msra.gmra.mrb[0].mxu0 (!%p848_p9), %vm547_vm0, %v545_v37 }
 0x1b0   : > { %v536_v34 = vadd.f32 %v527_v33, %v441_v30 }
 0x1b1   : > { %539 = vst [vmem:[#allocation2 + $0x8] sm:$0xff] %v537_v32 }
 0x1b2   : > { %538 = vst [vmem:[#allocation2] sm:$0xff] %v536_v34 }
 0x1b8   : > { %v632_v39 = vld [vmem:[#allocation2 + $0x8] sm:$0xff] }
 0x1b9   : > { %v631_v41 = vld [vmem:[#allocation2] sm:$0xff]  ;;  %v634_v42 = vadd.f32 %v632_v39, %v630_v38 }
 0x1ba   : > { %v633_v43 = vadd.f32 %v631_v41, %v629_v40 }
 0x282   : > { %v916_v44 = vpop.f32.mrb[0].mxu0 }
 0x283   : > { %v636_v45 = vadd.f32 %v916_v44, %v634_v42  ;;  %v620_v46 = vpop.f32.mrb[1].mxu0 }
 0x284   : > { %v635_v47 = vadd.f32 %v633_v43, %v620_v46 }
 0x285   : > { %638 = vst [vmem:[%s1661_s13 + $0x8] sm:$0xff] %v636_v45 }
 0x286   : > { %637 = vst [vmem:[%s1661_s13] sm:$0xff] %v635_v47 }
 0x287 PF: > { %s1842_s16 = sld [smem:[#allocation19_spill]]  ;;  %s1843_s18 = sld [smem:[#allocation26_spill]] }
 0x288   : > { %s1844_s24 = sld [smem:[#allocation30_spill]]  ;;  %s655_s14 = sshll.u32 %s1661_s13, 4  ;;  %s1703_s14 = int_to_ptr.vmem [resolvable:$true] %s655_s14 }
 0x289   : > { %s640_s7 = scalar_lea.sflag [#allocation5], %s1649_s27  ;;  %s1165_s5 = scalar_lea.vmem %s1703_s14, 256 }
 0x28a   : > { %p1166_p8 = scmp.ne.s32.totalorder %s1703_s14, %s1165_s5  ;;  %s1328_s9 = smov [#allocation10]  }
 0x28b   : > { %s1169_s2 = sshll.u32 %s1328_s9, 4  ;;  %s1170_s2 = int_to_ptr.vmem [resolvable:$false] %s1169_s2 }
 0x28c   : > { %s1171_s23 = scalar_lea.vmem %s1170_s2, 512  ;;  %p1172_p11 = scmp.lt.s32.totalorder %s1703_s14, %s1170_s2 }
 0x28d   : > { %s852_s28 = sshll.u32 %s1842_s16, 7  ;;  %p1846_p13 = scmp.ne.s32.totalorder %s1843_s18, 0 }
 0x28e   : > { %s1845_s10 = smov %s1844_s24  ;;  %s1700_s15 = scalar_lea.hbm %s1844_s24, %s852_s28 }
 0x28f   : > { %p1167_p4 = pnand %p1166_p8, %p1846_p13  ;;  %p1173_p3 = scmp.lt.s32.totalorder %s1171_s23, %s1165_s5 }
 0x291   : > { %p1168_p0 = pneg %p1167_p4  ;;  %p1174_p12 = por %p1173_p3, %p1172_p11 }
 0x293   : > { %p1175_p10 = pnand %p1174_p12, %p1168_p0 }
 0x295   : > { %1178 = shalt.err (!%p1175_p10)
}
 0x296   : > { %s1179_s13 = scalar_lea.hbm %s1700_s15, 256  ;;  %s1183_s21 = scalar_lea.hbm %s1845_s10, 512 }
 0x297   : > { %p1180_p5 = scmp.ne.s32.totalorder %s1700_s15, %s1179_s13  ;;  %p1184_p1 = scmp.lt.u32.totalorder %s1700_s15, %s1845_s10 }
 0x298   : > { %p1185_p6 = scmp.lt.u32.totalorder %s1183_s21, %s1179_s13  ;;  %p1187_p8 = scmp.lt.u32.totalorder %s1179_s13, %s1700_s15 }
 0x299   : > { %p1181_p2 = pnand %p1180_p5, %p1846_p13 }
 0x29a   : > { %p1186_p9 = por %p1185_p6, %p1184_p1 }
 0x29b   : > { %p1182_p7 = pneg %p1181_p2 }
 0x29c   : > { %p1188_p4 = por %p1187_p8, %p1186_p9 }
 0x29e   : > { %p1189_p0 = pnand %p1188_p4, %p1182_p7 }
 0x2a0   : > { %1192 = shalt.err (!%p1189_p0)
}
 0x2a1   : > { %s1329_s28 = smov 128   ;;  %s1330_s12 = smov 256  }
 0x2a2   : > { %s1331_s11 = smov 8  }
 0x2a3   : > { %955 = dma.vmem_to_hbm [thread:$0]  (%p1846_p13), %s1703_s14, 256, %s1700_s15, %s640_s7, %s1329_s28, %s1330_s12, %s1331_s11  }
 0x2a4 PF: > { %s1847_s24 = sld [smem:[#allocation15_spill]]  ;;  %s1848_s5 = sld [smem:[#allocation27_spill]] }
 0x2a5   : > { %p961_p11 = scmp.ge.s32.totalorder %s1319_s6, 2 }
 0x2aa   : > { %s670_s9 = sand.u32 1, %s1847_s24   ;;  %p1849_p3 = scmp.ne.s32.totalorder %s1848_s5, 0 }
 0x2ab   : > { %s671_s2 = scalar_lea.sflag [#allocation5], %s670_s9 }
 0x2ac   : > { %p958_p12 = pnand %p961_p11, %p1849_p3 }
 0x2ae   : > { %1262 = dma.done.wait (!%p958_p12), %s671_s2, 256  }
 0x2af   : > { %1264 = vsyncadd (!%p958_p12), %s671_s2, 4294967040  ;;  %s24_s6 = sadd.s32 1, %s1319_s6   ;;  %s1851_s18 = sld [smem:[#allocation16_spill]] }
 0x2b0   : > { %p1734_p10 = scmp.ge.s32.totalorder %s24_s6, 6   ;;  %s1852_s27 = sld [smem:[#allocation24_spill]] }
 0x2b1   : > { %s1853_s15 = sld [smem:[#allocation17_spill]]  ;;  %s1854_s14 = sld [smem:[#allocation23_spill]] }
 0x2b2   : > { %s1855_s7 = sld [smem:[#allocation22_spill]]  ;;  %s1856_s13 = sld [smem:[#allocation20_spill]] }
 0x2b3   : > { %s1857_s1 = sld [smem:[#allocation21_spill]]  ;;  %s1859_s19 = smov %s1275_s20 }
 0x2b4   : > { %s1861_s21 = smov %s1283_s22  ;;  %s1864_s24 = smov %s1295_s25 }
 0x2b5   : > { %s1865_s25 = smov %s1299_s26  ;;  %s1868_s28 = smov %s1315_s30 }
 0x2b6   : > { %s1860_s20 = smov %s1852_s27  ;;  %s1867_s27 = smov %s1311_s29 }
 0x2b7   : > { %s1862_s22 = smov %s1853_s15  ;;  %s1863_s23 = smov %s1854_s14 }
 0x2b8   : > { %s1866_s26 = smov %s1855_s7  ;;  %s1869_s29 = smov %s1856_s13 }
 0x2b9   : > { %s1870_s30 = smov %s1857_s1  ;;  %23 = sbr.rel (!%p1734_p10) target bundleno = 16 (0x10), region = 166 }
 0x2c0   :  { %676 = vsyncpa [#allocation4], 1 }
 0x2c1   :  { %678 = vsyncpa [#allocation4 + $0x1], 1 }
 0x2c2   :  { %679 = vsyncpa [#allocation7], 1 }
 0x2c3   :  { %681 = vsyncpa [#allocation7 + $0x1], 1 }
 0x2c4   :  { %682 = vsyncpa [#allocation5], 1 }
 0x2c5   :  { %684 = vsyncpa [#allocation5 + $0x1], 1 }

</bundles_post_ra>
